<compile_context>
chip_gen: v7x
topology: tpu7x:2x2x1
jax: 0.10.0
libtpu: 0.0.40
codegen_flags: <defaults>
</compile_context>

<pallas_src>
import functools

import jax
import jax.numpy as jnp
from jax.experimental import pallas as pl
from jax.experimental.pallas import tpu as pltpu


def _round_up(x, m):
    return (x + m - 1) // m * m


@functools.lru_cache(maxsize=None)
def _tpu_config():
    """Generation-aware block / VMEM budgeting.

    Budget per grid step ~= 2 x input block (double buffering) + ~2 tile-sized f32
    temporaries created by the element-wise phase.
      v5e/v6e (128 MiB VMEM/TC): ~12 MiB input block, 100 MiB scoped limit
      v7x     ( 64 MiB VMEM/TC): ~ 6 MiB input block,  48 MiB scoped limit
    """
    vmem_cap = 128 * 1024 * 1024
    version = ""
    try:
        info = pltpu.get_tpu_info()
        vmem_cap = int(getattr(info, "vmem_capacity_bytes", vmem_cap))
        version = str(getattr(info, "chip_version",
                              getattr(info, "version", ""))).lower()
    except Exception:
        pass  # fall back to conservative v6e-like defaults

    if vmem_cap <= 80 * 1024 * 1024 or "v7" in version:     # v7x-class TC (64 MiB)
        target_block_bytes = 6 * 1024 * 1024
        vmem_limit_bytes = 48 * 1024 * 1024
    else:                                                    # v5e / v6e (128 MiB)
        target_block_bytes = 12 * 1024 * 1024
        vmem_limit_bytes = 100 * 1024 * 1024

    # v5e (and older) have no bf16 VALU/EUP: upcast the tile once after load there.
    # On v6e/v7x keep the element-wise phase in the loaded (packed) dtype.
    upcast_early = ("v5" in version) or ("v4" in version) or ("v3" in version)
    return target_block_bytes, vmem_limit_bytes, upcast_early


def _ls_ce_kernel(x_ref, target_ref, out_ref, *,
                  smoothing, ignore_index, n_rows, tile_n,
                  from_logits, reduce_out, upcast_early):
    i = pl.program_id(0)

    x = x_ref[...]                          # (tile_n, V), input dtype (f32 or bf16)
    if upcast_early:                        # v5e-class: no bf16 VALU -> upcast once
        x = x.astype(jnp.float32)
    tgt = target_ref[...]                   # (tile_n, 1) int32
    vocab = x.shape[-1]

    eps_i = smoothing / vocab
    confidence = 1.0 - smoothing

    # Fused gather + uniform smoothing without materializing a dense weight tile:
    #   -sum_c w[r,c] * lp[r,c] == -(confidence * lp[r,tgt] + eps_i * sum_c lp[r,c])
    # where w[r,tgt] = confidence + eps_i, else eps_i (sum_c w == 1).
    col = jax.lax.broadcasted_iota(jnp.int32, x.shape, 1)
    is_tgt = col == tgt
    zero = jnp.zeros((), dtype=x.dtype)
    sum_x = jnp.sum(x, axis=-1, keepdims=True, dtype=jnp.float32)            # (tile_n,1)
    x_tgt = jnp.sum(jnp.where(is_tgt, x, zero), axis=-1, keepdims=True,
                    dtype=jnp.float32)                                       # (tile_n,1)

    if from_logits:
        # log_softmax fused in: lp = x - lse(x).  Since sum_c w == 1:
        #   row_loss = lse - confidence * x[tgt] - eps_i * sum_c x
        # exp(x - m) stays in the loaded dtype (bf16 exp on v6e/v7x keeps the single
        # EUP off the critical path); the sum and the log are accumulated in f32.
        m = jnp.max(x, axis=-1, keepdims=True)
        e = jnp.exp(x - m)
        se = jnp.sum(e, axis=-1, keepdims=True, dtype=jnp.float32)
        lse = m.astype(jnp.float32) + jnp.log(se)
        row_loss = lse - (confidence * x_tgt + eps_i * sum_x)
    else:
        row_loss = -(confidence * x_tgt + eps_i * sum_x)

    # Mask padded (ragged) rows and ignore_index rows.  Rows >= n_rows in the last
    # partial block contain unspecified HBM data; jnp.where does NOT propagate
    # NaN/inf from the unselected branch, so garbage rows (even through exp/log in
    # the from_logits path) are cleanly zeroed here.  Do not replace this `where`
    # with a multiply-by-mask.
    row = i * tile_n + jax.lax.broadcasted_iota(jnp.int32, (tile_n, 1), 0)
    valid = row < n_rows
    if ignore_index is not None:
        valid = jnp.logical_and(valid, tgt != ignore_index)
    row_loss = jnp.where(valid, row_loss, 0.0)

    if reduce_out:
        # One f32 partial sum per block -> lane-dense-free, no (N,1) masked stores,
        # output HBM traffic is num_tiles * 4 B.
        out_ref[...] = jnp.sum(row_loss).reshape(1, 1, 1)
    else:
        out_ref[...] = row_loss             # (tile_n, 1) per-row losses


def _ls_ce_call(x, target, *, smoothing, ignore_index, from_logits, reduce,
                tile_n=None):
    n, v = x.shape
    target_block_bytes, vmem_limit_bytes, upcast_early = _tpu_config()

    if tile_n is None:
        # Size the block in *input-dtype* bytes so bf16 streams 2x rows per step at
        # the same HBM traffic.  VMEM pads the lane dim to 128, so use max(v, 128).
        itemsize = jnp.dtype(x.dtype).itemsize
        tile_n = target_block_bytes // (max(v, 128) * itemsize)
    tile_n = int(max(8, min(tile_n, _round_up(n, 8))))   # don't exceed padded array
    tile_n = max(8, (tile_n // 8) * 8)                   # sublane-aligned
    # TODO(synk): for very large vocabularies (V ~ 256K f32 on v7x) even an 8-row
    # block plus its f32 temporaries presses on the 48 MiB scoped limit; add a
    # lane-aligned vocab grid axis ("arbitrary") with running weighted-sum /
    # online-LSE accumulation to restore tile_n >= 64.

    num_tiles = pl.cdiv(n, tile_n)
    n_pad = num_tiles * tile_n

    target2d = target.reshape(n, 1).astype(jnp.int32)
    # Note: target stays a per-tile (tile_n,1) block (not a resident full-array
    # block): a width-1 VMEM buffer pads to 128 lanes, so a resident copy would
    # cost N*512 B of VMEM at scale for no bandwidth win.

    kernel = functools.partial(
        _ls_ce_kernel,
        smoothing=float(smoothing),
        ignore_index=None if ignore_index is None else int(ignore_index),
        n_rows=n,
        tile_n=tile_n,
        from_logits=from_logits,
        reduce_out=reduce,
        upcast_early=upcast_early,
    )

    if reduce:
        out_shape = jax.ShapeDtypeStruct((num_tiles, 1, 1), jnp.float32)
        out_spec = pl.BlockSpec((1, 1, 1), lambda i: (i, 0, 0))
    else:
        # TODO(synk): lane-dense per-row output (transpose the (tile_n,1) column onto
        # lanes) for the reduce=False path; the default reduce=True path already
        # avoids the narrow store via per-block partial sums.
        out_shape = jax.ShapeDtypeStruct((n_pad, 1), jnp.float32)
        out_spec = pl.BlockSpec((tile_n, 1), lambda i: (i, 0))

    out = pl.pallas_call(
        kernel,
        out_shape=out_shape,
        grid_spec=pltpu.PrefetchScalarGridSpec(
            num_scalar_prefetch=0,
            grid=(num_tiles,),
            in_specs=[
                pl.BlockSpec((tile_n, v), lambda i: (i, 0)),   # lprobs / logits tile
                pl.BlockSpec((tile_n, 1), lambda i: (i, 0)),   # target tile
            ],
            out_specs=out_spec,
        ),
        compiler_params=pltpu.CompilerParams(
            # Blocks are independent (no serialized accumulator) so both v7x
            # TensorCores can stream disjoint row ranges.
            # TODO(synk): verify in xprof that the 1-D grid lands on both v7x TCs;
            # if not, add a leading core axis via pl.core_map / create_tensorcore_mesh.
            dimension_semantics=("parallel",),
            vmem_limit_bytes=vmem_limit_bytes,
        ),
    )(x, target2d)
    return out, n


def label_smoothed_ce_loss(lprobs, target, *, smoothing, ignore_index=None,
                           reduce=True, tile_n=None):
    """Equivalent of LabelSmoothedCrossEntropyCriterion(smoothing, ignore_index,
    reduce)(lprobs, target) with lprobs of shape (N, V), target of shape (N,)."""
    out, n = _ls_ce_call(lprobs, target, smoothing=smoothing,
                         ignore_index=ignore_index, from_logits=False,
                         reduce=reduce, tile_n=tile_n)
    if reduce:
        return jnp.sum(out)                 # (num_tiles,1,1) partials -> scalar
    per_row = out[:n]
    # Mirror the PyTorch module: (N,1) when ignore_index is set, (N,) otherwise.
    return per_row if ignore_index is not None else per_row[:, 0]


def label_smoothed_ce_loss_from_logits(logits, target, *, smoothing,
                                       ignore_index=None, reduce=True, tile_n=None):
    """Same loss, log_softmax fused into the kernel (single HBM pass over logits)."""
    out, n = _ls_ce_call(logits, target, smoothing=smoothing,
                         ignore_index=ignore_index, from_logits=True,
                         reduce=reduce, tile_n=tile_n)
    if reduce:
        return jnp.sum(out)
    per_row = out[:n]
    return per_row if ignore_index is not None else per_row[:, 0]


def _reference_loss(lprobs, target, *, smoothing, ignore_index=None, reduce=True):
    """Pure-JAX replica of the PyTorch forward."""
    tgt = target[..., None]
    nll = -jnp.take_along_axis(lprobs, tgt, axis=-1)
    smooth = -jnp.sum(lprobs, axis=-1, keepdims=True)
    if ignore_index is not None:
        pad = tgt == ignore_index
        nll = jnp.where(pad, 0.0, nll)
        smooth = jnp.where(pad, 0.0, smooth)
    if reduce:
        nll = jnp.sum(nll)
        smooth = jnp.sum(smooth)
    eps_i = smoothing / lprobs.shape[-1]
    return (1.0 - smoothing) * nll + eps_i * smooth


if __name__ == "__main__":
    batch, seq, vocab = 2, 8, 32
    smoothing = 0.1
    ignore_index = 1

    key = jax.random.PRNGKey(0)
    k_logits, k_tgt, k_pad = jax.random.split(key, 3)

    logits = jax.random.normal(k_logits, (batch, seq, vocab), dtype=jnp.float32)
    lprobs = jax.nn.log_softmax(logits, axis=-1)
    target = jax.random.randint(k_tgt, (batch, seq), 0, vocab, dtype=jnp.int32)
    pad_mask = jax.random.bernoulli(k_pad, 0.25, (batch, seq))
    target = jnp.where(pad_mask, ignore_index, target)

    # Flatten (batch, seq, vocab) -> (N, V) as fairseq does before the criterion.
    lprobs2d = lprobs.reshape(-1, vocab)
    logits2d = logits.reshape(-1, vocab)
    target1d = target.reshape(-1)

    ref = _reference_loss(lprobs2d, target1d,
                          smoothing=smoothing, ignore_index=ignore_index)

    # 1) Module-faithful path: log-probs in, reduced scalar out.
    loss = label_smoothed_ce_loss(lprobs2d, target1d,
                                  smoothing=smoothing, ignore_index=ignore_index)
    loss = jax.block_until_ready(loss)
    assert jnp.allclose(loss, ref, rtol=1e-5, atol=1e-4), (loss, ref)

    # 2) Ragged N + forced small tile exercises in-kernel row masking on a partial block.
    n_ragged = 13
    loss_r = label_smoothed_ce_loss(lprobs2d[:n_ragged], target1d[:n_ragged],
                                    smoothing=smoothing, ignore_index=ignore_index,
                                    tile_n=8)
    loss_r = jax.block_until_ready(loss_r)
    ref_r = _reference_loss(lprobs2d[:n_ragged], target1d[:n_ragged],
                            smoothing=smoothing, ignore_index=ignore_index)
    assert jnp.allclose(loss_r, ref_r, rtol=1e-5, atol=1e-4), (loss_r, ref_r)

    # 3) reduce=False, ignore_index=None -> per-row losses, shape (N,) like the module.
    per_row = label_smoothed_ce_loss(lprobs2d, target1d, smoothing=smoothing,
                                     ignore_index=None, reduce=False)
    per_row = jax.block_until_ready(per_row)
    ref_rows = _reference_loss(lprobs2d, target1d, smoothing=smoothing,
                               ignore_index=None, reduce=False)[:, 0]
    assert per_row.shape == (lprobs2d.shape[0],)
    assert jnp.allclose(per_row, ref_rows, rtol=1e-5, atol=1e-4)

    # 4) Fused log_softmax path: raw f32 logits in, single HBM pass.
    loss_f = label_smoothed_ce_loss_from_logits(
        logits2d, target1d, smoothing=smoothing, ignore_index=ignore_index)
    loss_f = jax.block_until_ready(loss_f)
    assert jnp.allclose(loss_f, ref, rtol=1e-5, atol=1e-4), (loss_f, ref)

    # 5) bf16 logits in HBM; bf16 element-wise phase, f32 accumulation in-kernel.
    logits_bf16 = logits2d.astype(jnp.bfloat16)
    loss_b = label_smoothed_ce_loss_from_logits(
        logits_bf16, target1d, smoothing=smoothing, ignore_index=ignore_index)
    loss_b = jax.block_until_ready(loss_b)
    ref_b = _reference_loss(
        jax.nn.log_softmax(logits_bf16.astype(jnp.float32), axis=-1),
        target1d, smoothing=smoothing, ignore_index=ignore_index)
    assert jnp.allclose(loss_b, ref_b, rtol=1e-2, atol=1e-2), (loss_b, ref_b)

    print("KERNEL_OK")
</pallas_src>

<mosaic_0001>
module attributes {stable_mosaic.version = 11 : i64} {
  func.func @_ls_ce_kernel(%arg0: i32, %arg1: memref<16x32xf32, #tpu.memory_space<vmem>>, %arg2: memref<16x1xi32, #tpu.memory_space<vmem>>, %arg3: memref<1x1x1xf32, #tpu.memory_space<vmem>>) attributes {dimension_semantics = [#tpu.dimension_semantics<parallel>], iteration_bounds = array<i64: 1>, scalar_prefetch = 0 : i64, scratch_operands = 0 : i64, tpu.core_type = #tpu.core_type<tc>, window_params = [{transform_indices = @transform_0, window_bounds = array<i64: 16, 32>}, {transform_indices = @transform_1, window_bounds = array<i64: 16, 1>}, {transform_indices = @transform_2, window_bounds = array<i64: 1, 1, 1>}]} {
    %c0 = arith.constant 0 : index
    %c0_0 = arith.constant 0 : index
    %0 = vector.load %arg1[%c0, %c0_0] : memref<16x32xf32, #tpu.memory_space<vmem>>, vector<16x32xf32>
    %c0_1 = arith.constant 0 : index
    %c0_2 = arith.constant 0 : index
    %1 = vector.load %arg2[%c0_1, %c0_2] : memref<16x1xi32, #tpu.memory_space<vmem>>, vector<16x1xi32>
    %2 = tpu.iota {dimensions = array<i32: 1>} : vector<16x32xi32>
    %3 = vector.broadcast %1 : vector<16x1xi32> to vector<16x32xi32>
    %4 = arith.cmpi eq, %2, %3 : vector<16x32xi32>
    %cst = arith.constant dense<0.000000e+00> : vector<16xf32>
    %5 = vector.multi_reduction <add>, %0, %cst [1] : vector<16x32xf32> to vector<16xf32>
    %6 = vector.shape_cast %5 : vector<16xf32> to vector<16x1xf32>
    %cst_3 = arith.constant 0.000000e+00 : f32
    %7 = vector.broadcast %cst_3 : f32 to vector<16x32xf32>
    %8 = arith.select %4, %0, %7 : vector<16x32xi1>, vector<16x32xf32>
    %cst_4 = arith.constant dense<0.000000e+00> : vector<16xf32>
    %9 = vector.multi_reduction <add>, %8, %cst_4 [1] : vector<16x32xf32> to vector<16xf32>
    %10 = vector.shape_cast %9 : vector<16xf32> to vector<16x1xf32>
    %cst_5 = arith.constant 0.899999976 : f32
    %11 = vector.broadcast %cst_5 : f32 to vector<16x1xf32>
    %12 = arith.mulf %11, %10 : vector<16x1xf32>
    %cst_6 = arith.constant 3.125000e-03 : f32
    %13 = vector.broadcast %cst_6 : f32 to vector<16x1xf32>
    %14 = arith.mulf %13, %6 : vector<16x1xf32>
    %15 = arith.addf %12, %14 : vector<16x1xf32>
    %cst_7 = arith.constant 0.000000e+00 : f32
    %16 = vector.broadcast %cst_7 : f32 to vector<16x1xf32>
    %17 = arith.subf %16, %15 : vector<16x1xf32>
    %c16_i32 = arith.constant 16 : i32
    %18 = arith.muli %arg0, %c16_i32 : i32
    %19 = tpu.iota {dimensions = array<i32: 0>} : vector<16x1xi32>
    %20 = vector.broadcast %18 : i32 to vector<16x1xi32>
    %21 = arith.addi %20, %19 : vector<16x1xi32>
    %c16_i32_8 = arith.constant 16 : i32
    %22 = vector.broadcast %c16_i32_8 : i32 to vector<16x1xi32>
    %23 = arith.cmpi slt, %21, %22 : vector<16x1xi32>
    %c1_i32 = arith.constant 1 : i32
    %24 = vector.broadcast %c1_i32 : i32 to vector<16x1xi32>
    %25 = arith.cmpi ne, %1, %24 : vector<16x1xi32>
    %26 = arith.andi %23, %25 : vector<16x1xi1>
    %cst_9 = arith.constant 0.000000e+00 : f32
    %27 = vector.broadcast %cst_9 : f32 to vector<16x1xf32>
    %28 = arith.select %26, %17, %27 : vector<16x1xi1>, vector<16x1xf32>
    %29 = vector.shape_cast %28 : vector<16x1xf32> to vector<1x16x1xf32>
    %cst_10 = arith.constant dense<0.000000e+00> : vector<1xf32>
    %30 = vector.multi_reduction <add>, %29, %cst_10 [1, 2] : vector<1x16x1xf32> to vector<1xf32>
    %31 = vector.shape_cast %30 : vector<1xf32> to vector<1x1x1xf32>
    %32 = vector.extract %31[0, 0, 0] : f32 from vector<1x1x1xf32>
    %33 = vector.broadcast %32 : f32 to vector<1x1x1xf32>
    %c0_11 = arith.constant 0 : index
    %c0_12 = arith.constant 0 : index
    %c0_13 = arith.constant 0 : index
    %34 = vector.load %arg3[%c0_11, %c0_12, %c0_13] : memref<1x1x1xf32, #tpu.memory_space<vmem>>, vector<1x1x1xf32>
    tpu.vector_store %arg3[%c0_11, %c0_12, %c0_13], %33 {strides = array<i32>} : memref<1x1x1xf32, #tpu.memory_space<vmem>>, vector<1x1x1xf32>,
    return
  }
  func.func @transform_0(%arg0: i32) -> (i32, i32) {
    %c0_i32 = arith.constant 0 : i32
    %c0_i32_0 = arith.constant 0 : i32
    return %arg0, %c0_i32 : i32, i32
  }
  func.func @transform_1(%arg0: i32) -> (i32, i32) {
    %c0_i32 = arith.constant 0 : i32
    %c0_i32_0 = arith.constant 0 : i32
    return %arg0, %c0_i32 : i32, i32
  }
  func.func @transform_2(%arg0: i32) -> (i32, i32, i32) {
    %c0_i32 = arith.constant 0 : i32
    %c0_i32_0 = arith.constant 0 : i32
    %c0_i32_1 = arith.constant 0 : i32
    return %arg0, %c0_i32, %c0_i32_0 : i32, i32, i32
  }
}

</mosaic_0001>

<bundles_post_ra>
// kernel: tpu_custom_call.1
= control target key start
LH: loop header
LB: loop body
LE: loop exit
PB: predicated region body
PF: predicated region fallthrough
CT: control target
= control target key end

     0   :  { %7 = vsyncpa [#allocation3], 0  ;;  %s266_s0 = inlined_call_operand.hbm [shape: f32[16,32], index: 0, kind: input, shape index: {}]   ;;  %s267_s1 = inlined_call_operand.hbm [shape: s32[16,1], index: 1, kind: input, shape index: {}]   ;;  %s268_s2 = inlined_call_operand.hbm [shape: f32[1,1,1], index: 2, kind: output, shape index: {}]  }
   0x1   :  { %8 = vsyncpa [#allocation6], 0 }
   0x2   :  { %9 = vsyncpa [#allocation4], 0  ;;  %s205_s9 = smov [#allocation2]   ;;  %s133_s13 = scalar_lea.hbm %s266_s0, 256 }
   0x3   :  { %s15_s10 = sshll.u32 %s205_s9, 4  ;;  %p134_p0 = scmp.ne.s32.totalorder %s266_s0, %s133_s13  ;;  %s16_s10 = int_to_ptr.vmem [resolvable:$true] %s15_s10 }
   0x4   :  { %p137_p1 = scmp.lt.u32.totalorder %s133_s13, %s266_s0 }
   0x6   :  { %p139_p2 = pnand %p137_p1, %p134_p0 }
   0x8   :  { %142 = shalt.err (!%p139_p2)
}
   0x9   :  { %s143_s18 = scalar_lea.vmem %s16_s10, 256  ;;  %p148_p4 = scmp.lt.s32.totalorder %s16_s10, %s16_s10 }
   0xa   :  { %p144_p3 = scmp.ne.s32.totalorder %s16_s10, %s143_s18  ;;  %p149_p5 = scmp.lt.s32.totalorder %s143_s18, %s143_s18 }
   0xc   :  { %p150_p6 = por %p149_p5, %p148_p4 }
   0xe   :  { %p151_p7 = pnand %p150_p6, %p144_p3 }
  0x10   :  { %154 = shalt.err (!%p151_p7)
}
  0x11   :  { %s206_s19 = smov 128   ;;  %s207_s20 = smov 8  }
  0x12   :  { %21 = dma.hbm_to_vmem [thread:$0]  %s266_s0, 256, %s16_s10, [#allocation3], %s206_s19, %s206_s19, %s207_s20  }
  0x13   :  { %s208_s23 = smov [#allocation5]   ;;  %s155_s27 = scalar_lea.hbm %s267_s1, 256 }
  0x14   :  { %s27_s24 = sshll.u32 %s208_s23, 4  ;;  %p156_p8 = scmp.ne.s32.totalorder %s267_s1, %s155_s27  ;;  %s28_s24 = int_to_ptr.vmem [resolvable:$true] %s27_s24 }
  0x15   :  { %p159_p9 = scmp.lt.u32.totalorder %s155_s27, %s267_s1 }
  0x17   :  { %p161_p10 = pnand %p159_p9, %p156_p8 }
  0x19   :  { %164 = shalt.err (!%p161_p10)
}
  0x1a   :  { %s165_s4 = scalar_lea.vmem %s28_s24, 256  ;;  %p170_p12 = scmp.lt.s32.totalorder %s28_s24, %s28_s24 }
  0x1b   :  { %p166_p11 = scmp.ne.s32.totalorder %s28_s24, %s165_s4  ;;  %p171_p13 = scmp.lt.s32.totalorder %s165_s4, %s165_s4 }
  0x1d   :  { %p172_p0 = por %p171_p13, %p170_p12 }
  0x1f   :  { %p173_p1 = pnand %p172_p0, %p166_p11 }
  0x21   :  { %176 = shalt.err (!%p173_p1)
}
  0x22   :  { %33 = dma.hbm_to_vmem [thread:$0]  %s267_s1, 256, %s28_s24, [#allocation6], %s206_s19, %s206_s19, %s207_s20  }
  0x23   :  { %199 = dma.done.wait [#allocation3], 256  }
  0x24   :  { %200 = vsyncadd [#allocation3], 4294967040 }
  0x25   :  { %201 = dma.done.wait [#allocation6], 256  }
  0x26   :  { %202 = vsyncadd [#allocation6], 4294967040  ;;  %v209_v0 = vmov 0   ;;  %vm54_vm0 = vcmask 261120   ;;  %v42_v1 = vld [vmem:[#allocation5] sm:$0xff]  ;;  %v40_v2 = vld [vmem:[#allocation2] sm:$0xff]  ;;  %v44_v7 = vlaneseq }
  0x27   :  { %132 = vset.pattern.permute.xlu0 %v209_v0  ;;  %v55_v3 = vsel %vm54_vm0, %v40_v2, 0.0  ;;  %v43_v4 = vld [vmem:[#allocation5 + $0x8] sm:$0xff]  ;;  %v41_v5 = vld [vmem:[#allocation2 + $0x8] sm:$0xff]  ;;  %vm86_vm3 = vcmp.ne.s32.totalorder %v42_v1, 1  ;;  %vm92_vm5 = vcmask 7168   ;;  %s210_s1 = smov [#allocation7]  }
  0x28   :  { %47 = vperm.xlu0 %132, %v42_v1   ;;  %56 = vadd.xlane.f32.xlu1 %v55_v3  ;;  %v58_v6 = vsel %vm54_vm0, %v41_v5, 0.0  ;;  %v45_v8 = vand.u32 127, %v44_v7  ;;  %vm87_vm4 = vcmp.ne.s32.totalorder %v43_v4, 1  ;;  %s114_s6 = sshll.u32 %s210_s1, 4  ;;  %vm106_vm6 = vcmask 0   ;;  %s115_s6 = int_to_ptr.vmem [resolvable:$true] %s114_s6 }
  0x29   :  { %s177_s8 = scalar_lea.vmem %s115_s6, 16  ;;  %s181_s9 = scalar_lea.vmem %s115_s6, 32 }
  0x2a   :  { %p178_p2 = scmp.ne.s32.totalorder %s115_s6, %s177_s8  ;;  %p182_p3 = scmp.lt.s32.totalorder %s115_s6, %s115_s6 }
  0x2b   :  { %p183_p4 = scmp.lt.s32.totalorder %s181_s9, %s177_s8 }
  0x2c   :  { %50 = vperm.xlu0 %132, %v43_v4   ;;  %59 = vadd.xlane.f32.xlu1 %v58_v6 }
  0x2d   :  { %p184_p5 = por %p183_p4, %p182_p3 }
  0x2f   :  { %p185_p6 = pnand %p184_p5, %p178_p2 }
  0xa7   :  { %v48_v9 = vpop.permute.xlu0 %47 }
  0xa8   :  { %vm52_vm1 = vcmp.eq.s32.totalorder %v45_v8, %v48_v9 }
  0xa9   :  { %v61_v10 = vsel %vm52_vm1, %v40_v2, 0.0 }
  0xaa   :  { %v63_v11 = vsel %vm54_vm0, %v61_v10, 0.0 }
  0xab   :  { %v51_v12 = vpop.permute.xlu0 %50  ;;  %64 = vadd.xlane.f32.xlu0 %v63_v11 }
  0xac   :  { %vm53_vm2 = vcmp.eq.s32.totalorder %v45_v8, %v51_v12 }
  0xad   :  { %v62_v13 = vsel %vm53_vm2, %v41_v5, 0.0 }
  0xae   :  { %v66_v14 = vsel %vm54_vm0, %v62_v13, 0.0 }
  0xaf   :  { %67 = vadd.xlane.f32.xlu1 %v66_v14 }
  0xb5   :  { %v57_v15 = vpop.xlane.xlu1 %56 }
  0xb6   :  { %v71_v18 = vmul.f32 0.003125, %v57_v15 }
  0xb9   :  { %v60_v16 = vpop.xlane.xlu1 %59 }
  0xba   :  { %v72_v23 = vmul.f32 0.003125, %v60_v16 }
 0x138   :  { %v65_v17 = vpop.xlane.xlu0 %64 }
 0x139   :  { %v69_v19 = vmul.f32 0.9, %v65_v17 }
 0x13b   :  { %v73_v20 = vadd.f32 %v71_v18, %v69_v19 }
 0x13c   :  { %v68_v21 = vpop.xlane.xlu1 %67 }
 0x13d   :  { %v75_v22 = vsub.f32 0.0, %v73_v20  ;;  %v70_v24 = vmul.f32 0.9, %v68_v21 }
 0x13f   :  { %v74_v25 = vadd.f32 %v72_v23, %v70_v24  ;;  %v90_v27 = vsel %vm86_vm3, %v75_v22, 0.0 }
 0x140   :  { %v93_v29 = vsel %vm92_vm5, %v90_v27, 0.0 }
 0x141   :  { %v76_v26 = vsub.f32 0.0, %v74_v25 }
 0x143   :  { %v91_v28 = vsel %vm87_vm4, %v76_v26, 0.0 }
 0x144   :  { %v94_v30 = vsel %vm92_vm5, %v91_v28, 0.0 }
 0x145   :  { %v95_v31 = vadd.f32 %v94_v30, %v93_v29 }
 0x147   :  { %96 = vadd.xlane.f32.xlu1 %v95_v31 }
 0x1d4   :  { %v97_v32 = vpop.xlane.xlu1 %96 }
 0x1d5   :  { %v98_v33 = vrot.slane %v97_v32, 4 }
 0x1d7   :  { %v99_v34 = vadd.f32 %v98_v33, %v97_v32 }
 0x1d9   :  { %v100_v35 = vrot.slane %v99_v34, 2 }
 0x1db   :  { %v101_v36 = vadd.f32 %v100_v35, %v99_v34 }
 0x1dd   :  { %v102_v37 = vrot.slane %v101_v36, 1 }
 0x1df   :  { %v103_v38 = vadd.f32 %v102_v37, %v101_v36 }
 0x1e1   :  { %124 = vpush %v103_v38 }
 0x212   :  { %s125_s7 = spop %124 }
 0x213   :  { %v105_v39 = vstv %s125_s7 }
 0x214   :  { %107 = vst.msk [vmem:[#allocation7] sm:$0x1] %vm106_vm6, %v105_v39 }
 0x215   :  { %188 = shalt.err (!%p185_p6)
}
 0x216   :  { %s189_s12 = scalar_lea.hbm %s268_s2, 16 }
 0x217   :  { %p190_p7 = scmp.ne.s32.totalorder %s268_s2, %s189_s12  ;;  %p193_p8 = scmp.lt.u32.totalorder %s189_s12, %s268_s2 }
 0x219   :  { %p195_p9 = pnand %p193_p8, %p190_p7 }
 0x21b   :  { %198 = shalt.err (!%p195_p9)
}
 0x21c   :  { %117 = dma.vmem_to_hbm [thread:$0]  %s115_s6, 16, %s268_s2, [#allocation4]  }
 0x21d   :  { %203 = dma.done.wait [#allocation4], 16  }
 0x21e   :  { %204 = vsyncadd [#allocation4], 4294967280 }
 0x21f   :  { %121 = vsyncpa [#allocation3], 1 }
 0x220   :  { %122 = vsyncpa [#allocation6], 1 }
 0x221   :  { %123 = vsyncpa [#allocation4], 1 }

</bundles_post_ra>
